<compile_context>
chip_gen: v7x
topology: tpu7x:2x2x1
jax: 0.10.0
libtpu: 0.0.40
codegen_flags: <defaults>
</compile_context>

<pallas_src>
import functools

import jax
import jax.numpy as jnp
import numpy as np
from jax import lax
from jax.experimental import pallas as pl
from jax.experimental.pallas import tpu as pltpu


def _mod_ce_kernel(t_ref, x_ref, out_ref, acc_ref, counts_ref, *,
                   smoothing, num_classes, num_rows, num_targets, tile_rows):
    i = pl.program_id(0)

    # --- one-time init: zero the accumulator and histogram the (SMEM, scalar-
    #     prefetched) targets into a persistent per-class count row.
    @pl.when(i == 0)
    def _():
        acc_ref[...] = jnp.zeros_like(acc_ref)
        counts_ref[...] = jnp.zeros_like(counts_ref)
        cls_ids = lax.broadcasted_iota(jnp.int32, (1, num_classes), 1)

        def add_target(j, carry):
            counts_ref[...] = counts_ref[...] + (
                cls_ids == t_ref[j]).astype(jnp.float32)
            return carry

        lax.fori_loop(0, num_targets, add_target, 0)

    # --- per-tile softmax statistics (classes on the lane axis).
    x = x_ref[...].astype(jnp.float32)                      # (TB, C)
    m = jnp.max(x, axis=-1, keepdims=True)                  # (TB, 1)
    e = jnp.exp(x - m)                                      # (TB, C)
    se = jnp.sum(e, axis=-1, keepdims=True)                 # (TB, 1)
    rinv = 1.0 / se                                         # TB exact divides only

    # 1 - smooth_prob, fused & numerically stable:
    #   (1-s) * (sum_e - e)/sum_e + s*(C-1)/C   (>= 0 by construction)
    other_mass = (se - e) * rinv                            # = 1 - prob
    one_minus = ((1.0 - smoothing) * other_mass
                 + smoothing * (num_classes - 1) / num_classes)
    logv = jnp.log(one_minus)                               # (TB, C)

    # Reweight each class column by how many targets hit it; mask padded rows
    # and never-targeted classes (avoids 0 * (-inf) when smoothing == 0).
    counts = counts_ref[...]                                # (1, C)
    row_ids = i * tile_rows + lax.broadcasted_iota(jnp.int32, (tile_rows, 1), 0)
    keep = jnp.logical_and(row_ids < num_rows, counts > 0.0)   # (TB, C)
    contrib = jnp.where(keep, logv * counts, 0.0)
    acc_ref[...] += jnp.sum(contrib, keepdims=True)         # (1, 1)

    # --- finalize: mean over the true B*T elements.
    @pl.when(i == pl.num_programs(0) - 1)
    def _():
        out_ref[...] = acc_ref[...] * (1.0 / (num_rows * num_targets))


def _round_up(n, m):
    return ((n + m - 1) // m) * m


def modified_cross_entropy_loss(x, target, smoothing=0.1, block_rows=None):
    """x: (B, C) float array, target: (T,) int array of class indices."""
    B, C = x.shape
    T = int(target.shape[0])

    if block_rows is None:
        # Keep one input tile around ~2 MiB of f32 so that double-buffered input
        # plus f32 temporaries stays well inside scoped VMEM on every generation
        # (16 MiB default v5e, 32 MiB v6e/v7x scoped, 64 MiB physical v7x).
        rows_for_budget = max(8, ((2 * 2 ** 20) // (4 * C)) // 8 * 8)
        block_rows = int(min(512, rows_for_budget, _round_up(B, 8)))
    tb = int(block_rows)
    assert tb % 8 == 0, "block_rows must be a multiple of 8"

    bp = _round_up(B, tb)
    if bp != B:
        x = jnp.pad(x, ((0, bp - B), (0, 0)))
    grid = (bp // tb,)

    t = target.astype(jnp.int32).reshape(T)

    kernel = functools.partial(
        _mod_ce_kernel,
        smoothing=float(smoothing),
        num_classes=C,
        num_rows=B,
        num_targets=T,
        tile_rows=tb,
    )

    grid_spec = pltpu.PrefetchScalarGridSpec(
        num_scalar_prefetch=1,
        grid=grid,
        in_specs=[pl.BlockSpec((tb, C), lambda i, targets: (i, 0))],
        out_specs=pl.BlockSpec((1, 1), lambda i, targets: (0, 0)),
        scratch_shapes=[
            pltpu.VMEM((1, 1), jnp.float32),      # running sum of log terms
            pltpu.VMEM((1, C), jnp.float32),      # per-class target counts
        ],
    )

    # Deliberate scoped-VMEM budget: double-buffered input tile + a few f32
    # temporaries + the count row; generous floor, capped under v7x's 64 MiB.
    vmem_est = 4 * (8 * tb * C + 2 * C + 64)
    vmem_limit = int(min(max(2 * vmem_est, 16 * 2 ** 20), 48 * 2 ** 20))

    cost = pl.CostEstimate(
        flops=8 * bp * C,
        transcendentals=2 * bp * C,            # exp + log over the tile stream
        bytes_accessed=bp * C * x.dtype.itemsize + T * 4 + 4,
    )

    out = pl.pallas_call(
        kernel,
        out_shape=jax.ShapeDtypeStruct((1, 1), jnp.float32),
        grid_spec=grid_spec,
        compiler_params=pltpu.CompilerParams(
            # The batch axis carries the running-sum accumulator.
            dimension_semantics=("arbitrary",),
            vmem_limit_bytes=vmem_limit,
        ),
        cost_estimate=cost,
    )(t, x)
    return out[0, 0]


def _reference(x, target, smoothing=0.1):
    prob = jax.nn.softmax(x.astype(jnp.float32), axis=-1)
    C = x.shape[-1]
    smooth = (1.0 - smoothing) * prob + smoothing / C
    gathered = smooth[:, target]                 # (B, T)
    return jnp.mean(jnp.log(1.0 - gathered))


if __name__ == "__main__":
    key = jax.random.PRNGKey(0)

    cases = [
        # (B,  C,  T,  smoothing, block_rows)
        (8, 32, 8, 0.1, None),     # original small test, single tile
        (10, 6, 10, 0.1, 8),       # padded batch rows + multi-step accumulator
        (24, 16, 24, 0.0, 8),      # 3-tile grid, no smoothing
    ]
    for idx, (B, C, T, s, br) in enumerate(cases):
        kx, kt, key = jax.random.split(key, 3)
        x = jax.random.normal(kx, (B, C), dtype=jnp.float32)
        target = jax.random.randint(kt, (T,), 0, C, dtype=jnp.int32)

        loss = jax.block_until_ready(
            modified_cross_entropy_loss(x, target, smoothing=s, block_rows=br))
        ref = jax.block_until_ready(_reference(x, target, smoothing=s))
        assert np.allclose(np.asarray(loss), np.asarray(ref),
                           rtol=1e-5, atol=1e-5), (idx, loss, ref)

    print("KERNEL_OK")
</pallas_src>

<mosaic_0001>
module attributes {stable_mosaic.version = 11 : i64} {
  func.func @_mod_ce_kernel(%arg0: i32, %arg1: memref<8xi32, #tpu.memory_space<smem>>, %arg2: memref<8x32xf32, #tpu.memory_space<vmem>>, %arg3: memref<1x1xf32, #tpu.memory_space<vmem>>, %arg4: memref<1x1xf32, #tpu.memory_space<vmem>>, %arg5: memref<1x32xf32, #tpu.memory_space<vmem>>) attributes {dimension_semantics = [#tpu.dimension_semantics<arbitrary>], iteration_bounds = array<i64: 1>, scalar_prefetch = 1 : i64, scratch_operands = 2 : i64, tpu.core_type = #tpu.core_type<tc>, window_params = [{transform_indices = @transform_0, window_bounds = array<i64: 8, 32>}, {pipeline_mode = #tpu.pipeline_mode<synchronous>, transform_indices = @transform_1, window_bounds = array<i64: 1, 1>}]} {
    %c0_i32 = arith.constant 0 : i32
    %0 = arith.cmpi eq, %arg0, %c0_i32 : i32
    %1 = arith.extui %0 : i1 to i32
    %c0_i32_0 = arith.constant 0 : i32
    %2 = arith.cmpi ne, %1, %c0_i32_0 : i32
    scf.if %2 {
      %cst_18 = arith.constant 0.000000e+00 : f32
      %49 = vector.broadcast %cst_18 : f32 to vector<1x1xf32>
      %c0_19 = arith.constant 0 : index
      %c0_20 = arith.constant 0 : index
      %50 = vector.load %arg4[%c0_19, %c0_20] : memref<1x1xf32, #tpu.memory_space<vmem>>, vector<1x1xf32>
      tpu.vector_store %arg4[%c0_19, %c0_20], %49 {strides = array<i32>} : memref<1x1xf32, #tpu.memory_space<vmem>>, vector<1x1xf32>,
      %cst_21 = arith.constant 0.000000e+00 : f32
      %51 = vector.broadcast %cst_21 : f32 to vector<1x32xf32>
      %c0_22 = arith.constant 0 : index
      %c0_23 = arith.constant 0 : index
      %52 = vector.load %arg5[%c0_22, %c0_23] : memref<1x32xf32, #tpu.memory_space<vmem>>, vector<1x32xf32>
      tpu.vector_store %arg5[%c0_22, %c0_23], %51 {strides = array<i32>} : memref<1x32xf32, #tpu.memory_space<vmem>>, vector<1x32xf32>,
      %53 = tpu.iota {dimensions = array<i32: 1>} : vector<1x32xi32>
      %c0_i32_24 = arith.constant 0 : i32
      %c8_i32_25 = arith.constant 8 : i32
      %54 = arith.addi %c0_i32_24, %c8_i32_25 : i32
      %c1_i32 = arith.constant 1 : i32
      scf.for %arg6 = %c0_i32_24 to %54 step %c1_i32  : i32 {
        %c0_27 = arith.constant 0 : index
        %c0_28 = arith.constant 0 : index
        %55 = vector.load %arg5[%c0_27, %c0_28] : memref<1x32xf32, #tpu.memory_space<vmem>>, vector<1x32xf32>
        %56 = arith.index_cast %arg6 : i32 to index
        %57 = memref.load %arg1[%56] : memref<8xi32, #tpu.memory_space<smem>>
        %58 = vector.broadcast %57 : i32 to vector<1x32xi32>
        %59 = arith.cmpi eq, %53, %58 : vector<1x32xi32>
        %60 = arith.extui %59 : vector<1x32xi1> to vector<1x32xi32>
        %61 = arith.sitofp %60 : vector<1x32xi32> to vector<1x32xf32>
        %62 = arith.addf %55, %61 : vector<1x32xf32>
        %c0_29 = arith.constant 0 : index
        %c0_30 = arith.constant 0 : index
        %63 = vector.load %arg5[%c0_29, %c0_30] : memref<1x32xf32, #tpu.memory_space<vmem>>, vector<1x32xf32>
        tpu.vector_store %arg5[%c0_29, %c0_30], %62 {strides = array<i32>} : memref<1x32xf32, #tpu.memory_space<vmem>>, vector<1x32xf32>,
      }
      %c8_i32_26 = arith.constant 8 : i32
    } else {
    }
    %c0 = arith.constant 0 : index
    %c0_1 = arith.constant 0 : index
    %3 = vector.load %arg2[%c0, %c0_1] : memref<8x32xf32, #tpu.memory_space<vmem>>, vector<8x32xf32>
    %cst = arith.constant dense<0xFF800000> : vector<8xf32>
    %4 = vector.multi_reduction <maximumf>, %3, %cst [1] : vector<8x32xf32> to vector<8xf32>
    %5 = vector.shape_cast %4 : vector<8xf32> to vector<8x1xf32>
    %6 = vector.broadcast %5 : vector<8x1xf32> to vector<8x32xf32>
    %7 = arith.subf %3, %6 : vector<8x32xf32>
    %8 = math.exp %7 : vector<8x32xf32>
    %cst_2 = arith.constant dense<0.000000e+00> : vector<8xf32>
    %9 = vector.multi_reduction <add>, %8, %cst_2 [1] : vector<8x32xf32> to vector<8xf32>
    %10 = vector.shape_cast %9 : vector<8xf32> to vector<8x1xf32>
    %cst_3 = arith.constant 1.000000e+00 : f32
    %11 = vector.broadcast %cst_3 : f32 to vector<8x1xf32>
    %12 = arith.divf %11, %10 : vector<8x1xf32>
    %13 = vector.broadcast %10 : vector<8x1xf32> to vector<8x32xf32>
    %14 = arith.subf %13, %8 : vector<8x32xf32>
    %15 = vector.broadcast %12 : vector<8x1xf32> to vector<8x32xf32>
    %16 = arith.mulf %14, %15 : vector<8x32xf32>
    %cst_4 = arith.constant 0.899999976 : f32
    %17 = vector.broadcast %cst_4 : f32 to vector<8x32xf32>
    %18 = arith.mulf %17, %16 : vector<8x32xf32>
    %cst_5 = arith.constant 0.096874997 : f32
    %19 = vector.broadcast %cst_5 : f32 to vector<8x32xf32>
    %20 = arith.addf %18, %19 : vector<8x32xf32>
    %21 = math.log %20 : vector<8x32xf32>
    %c0_6 = arith.constant 0 : index
    %c0_7 = arith.constant 0 : index
    %22 = vector.load %arg5[%c0_6, %c0_7] : memref<1x32xf32, #tpu.memory_space<vmem>>, vector<1x32xf32>
    %c8_i32 = arith.constant 8 : i32
    %23 = arith.muli %arg0, %c8_i32 : i32
    %24 = tpu.iota {dimensions = array<i32: 0>} : vector<8x1xi32>
    %25 = vector.broadcast %23 : i32 to vector<8x1xi32>
    %26 = arith.addi %25, %24 : vector<8x1xi32>
    %c8_i32_8 = arith.constant 8 : i32
    %27 = vector.broadcast %c8_i32_8 : i32 to vector<8x1xi32>
    %28 = arith.cmpi slt, %26, %27 : vector<8x1xi32>
    %cst_9 = arith.constant 0.000000e+00 : f32
    %29 = vector.broadcast %cst_9 : f32 to vector<1x32xf32>
    %30 = arith.cmpf ogt, %22, %29 : vector<1x32xf32>
    %31 = vector.broadcast %28 : vector<8x1xi1> to vector<8x32xi1>
    %32 = vector.broadcast %30 : vector<1x32xi1> to vector<8x32xi1>
    %33 = arith.andi %31, %32 : vector<8x32xi1>
    %34 = vector.broadcast %22 : vector<1x32xf32> to vector<8x32xf32>
    %35 = arith.mulf %21, %34 : vector<8x32xf32>
    %cst_10 = arith.constant 0.000000e+00 : f32
    %36 = vector.broadcast %cst_10 : f32 to vector<8x32xf32>
    %37 = arith.select %33, %35, %36 : vector<8x32xi1>, vector<8x32xf32>
    %c0_11 = arith.constant 0 : index
    %c0_12 = arith.constant 0 : index
    %38 = vector.load %arg4[%c0_11, %c0_12] : memref<1x1xf32, #tpu.memory_space<vmem>>, vector<1x1xf32>
    %39 = vector.shape_cast %37 : vector<8x32xf32> to vector<1x8x32xf32>
    %cst_13 = arith.constant dense<0.000000e+00> : vector<1xf32>
    %40 = vector.multi_reduction <add>, %39, %cst_13 [1, 2] : vector<1x8x32xf32> to vector<1xf32>
    %41 = vector.shape_cast %40 : vector<1xf32> to vector<1x1x1xf32>
    %42 = vector.extract %41[0, 0, 0] : f32 from vector<1x1x1xf32>
    %43 = vector.broadcast %42 : f32 to vector<1x1xf32>
    %44 = arith.addf %38, %43 : vector<1x1xf32>
    %c0_14 = arith.constant 0 : index
    %c0_15 = arith.constant 0 : index
    %45 = vector.load %arg4[%c0_14, %c0_15] : memref<1x1xf32, #tpu.memory_space<vmem>>, vector<1x1xf32>
    tpu.vector_store %arg4[%c0_14, %c0_15], %44 {strides = array<i32>} : memref<1x1xf32, #tpu.memory_space<vmem>>, vector<1x1xf32>,
    %c0_i32_16 = arith.constant 0 : i32
    %46 = arith.cmpi eq, %arg0, %c0_i32_16 : i32
    %47 = arith.extui %46 : i1 to i32
    %c0_i32_17 = arith.constant 0 : i32
    %48 = arith.cmpi ne, %47, %c0_i32_17 : i32
    scf.if %48 {
      %c0_18 = arith.constant 0 : index
      %c0_19 = arith.constant 0 : index
      %49 = vector.load %arg4[%c0_18, %c0_19] : memref<1x1xf32, #tpu.memory_space<vmem>>, vector<1x1xf32>
      %cst_20 = arith.constant 1.562500e-02 : f32
      %50 = vector.broadcast %cst_20 : f32 to vector<1x1xf32>
      %51 = arith.mulf %49, %50 : vector<1x1xf32>
      %c0_21 = arith.constant 0 : index
      %c0_22 = arith.constant 0 : index
      %52 = vector.load %arg3[%c0_21, %c0_22] : memref<1x1xf32, #tpu.memory_space<vmem>>, vector<1x1xf32>
      tpu.vector_store %arg3[%c0_21, %c0_22], %51 {strides = array<i32>} : memref<1x1xf32, #tpu.memory_space<vmem>>, vector<1x1xf32>,
    } else {
    }
    return
  }
  func.func @transform_0(%arg0: i32, %arg1: memref<8xi32, #tpu.memory_space<smem>>) -> (i32, i32) {
    %c0_i32 = arith.constant 0 : i32
    %c0_i32_0 = arith.constant 0 : i32
    return %arg0, %c0_i32 : i32, i32
  }
  func.func @transform_1(%arg0: i32, %arg1: memref<8xi32, #tpu.memory_space<smem>>) -> (i32, i32) {
    %c0_i32 = arith.constant 0 : i32
    %c0_i32_0 = arith.constant 0 : i32
    %c0_i32_1 = arith.constant 0 : i32
    return %c0_i32, %c0_i32_0 : i32, i32
  }
}

</mosaic_0001>

<bundles_post_ra>
// kernel: tpu_custom_call.1
= control target key start
LH: loop header
LB: loop body
LE: loop exit
PB: predicated region body
PF: predicated region fallthrough
CT: control target
= control target key end

     0   :  { %s291_s0 = inlined_call_operand.hbm [shape: s32[8], index: 0, kind: input, shape index: {}]   ;;  %s292_s1 = inlined_call_operand.hbm [shape: f32[8,32], index: 1, kind: input, shape index: {}]   ;;  %s293_s2 = inlined_call_operand.hbm [shape: f32[1,1], index: 2, kind: output, shape index: {}]  }
   0x1   :  { %s158_s11 = scalar_lea.hbm %s291_s0, 16 }
   0x2   :  { %p159_p0 = scmp.ne.s32.totalorder %s291_s0, %s158_s11  ;;  %p162_p1 = scmp.lt.u32.totalorder %s158_s11, %s291_s0 }
   0x4   :  { %p164_p2 = pnand %p162_p1, %p159_p0 }
   0x6   :  { %167 = shalt.err (!%p164_p2)  }
   0x7   :  { %s226_s16 = smov [#allocation5]  }
   0x8   :  { %8 = dma.hbm_to_smem %s291_s0, 16, %s226_s16, [#allocation4] }
   0x9   :  { %216 = dma.done.wait [#allocation4], 16 }
   0xa   :  { %217 = vsyncadd [#allocation4], 4294967280 }
   0xb   :  { %10 = sfence }
   0xc   :  { %11 = vsyncpa [#allocation7], 0 }
   0xd   :  { %12 = vsyncpa [#allocation8], 0  ;;  %s227_s19 = smov [#allocation6]   ;;  %s168_s23 = scalar_lea.hbm %s292_s1, 128 }
   0xe   :  { %s19_s20 = sshll.u32 %s227_s19, 4  ;;  %p169_p3 = scmp.ne.s32.totalorder %s292_s1, %s168_s23  ;;  %s20_s20 = int_to_ptr.vmem [resolvable:$true] %s19_s20 }
   0xf   :  { %p172_p4 = scmp.lt.u32.totalorder %s168_s23, %s292_s1 }
  0x11   :  { %p174_p5 = pnand %p172_p4, %p169_p3 }
  0x13   :  { %177 = shalt.err (!%p174_p5)
}
  0x14   :  { %s178_s0 = scalar_lea.vmem %s20_s20, 128  ;;  %p183_p7 = scmp.lt.s32.totalorder %s20_s20, %s20_s20 }
  0x15   :  { %p179_p6 = scmp.ne.s32.totalorder %s20_s20, %s178_s0  ;;  %p184_p8 = scmp.lt.s32.totalorder %s178_s0, %s178_s0 }
  0x17   :  { %p185_p9 = por %p184_p8, %p183_p7 }
  0x19   :  { %p186_p10 = pnand %p185_p9, %p179_p6 }
  0x1b   :  { %189 = shalt.err (!%p186_p10)
}
  0x1c   :  { %22 = dma.hbm_to_vmem [thread:$0]  %s292_s1, 128, %s20_s20, [#allocation7]  }
  0x1d   :  { %218 = dma.done.wait [#allocation7], 128  }
  0x1e   :  { %219 = vsyncadd [#allocation7], 4294967168  ;;  %vm30_vm0 = vcmask 0   ;;  %vm32_vm1 = vcmask 253952   ;;  %v34_v0 = vlaneseq  ;;  %v228_v1 = vmov 0.0   ;;  %s222_s30 = smov 0  }
  0x1f   :  { %31 = vst.msk [vmem:[#allocation2] sm:$0x1] %vm30_vm0, %v228_v1 }
  0x20   :  { %33 = vst.msk [vmem:[#allocation3] sm:$0x1] %vm32_vm1, %v228_v1  ;;  %v35_v2 = vand.u32 127, %v34_v0 }
  0x21 LB: > { %s43_s3 = sld [smem:[#allocation5 + %s224_s30]]  ;;  %v229_v5 = vmov 0.0   ;;  %s41_s30 = sadd.s32 1, %s224_s30   ;;  %s224_s30 = sphi %s222_s30, %s41_s30  }
  0x22   : > { %p38_p11 = scmp.ge.s32.totalorder %s41_s30, 8  }
  0x23   :  { %v50_v8 = vld [vmem:[#allocation6] sm:$0xff] (%p38_p11)  ;;  %vm51_vm3 = vcmask (%p38_p11), 261120   ;;  %v81_v22 = vshrl.u32 (%p38_p11), %v34_v0, 7  ;;  %v230_v24 = vmov (%p38_p11), 0   ;;  %s231_s4 = smov (%p38_p11), [#allocation9]  }
  0x24   :  { %v52_v9 = vsel (%p38_p11), %vm51_vm3, %v50_v8, -inf  ;;  %s121_s5 = sshll.u32 (%p38_p11), %s231_s4, 4  ;;  %s122_s5 = int_to_ptr.vmem [resolvable:$true] %s121_s5 }
  0x25   :  { %53 = vmax.xlane.f32.xlu0 (%p38_p11), %v52_v9  ;;  %v82_v23 = vsub.s32 (%p38_p11), 0, %v81_v22  ;;  %s190_s6 = scalar_lea.vmem (%p38_p11), %s122_s5, 16  ;;  %s194_s7 = scalar_lea.vmem (%p38_p11), %s122_s5, 32 }
  0x26   :  { %40 = sbr.rel (!%p38_p11) target bundleno = 33 (0x21), region = 43  ;;  %v94_v40 = vld [vmem:[#allocation2] sm:$0x1] (%p38_p11)  ;;  %p191_p12 = scmp.ne.s32.totalorder (%p38_p11), %s122_s5, %s190_s6 }
  0x27   : > { %v42_v3 = vld [vmem:[#allocation3] sm:$0x1]  ;;  %v44_v4 = vstv %s43_s3  ;;  %p195_p13 = scmp.lt.s32.totalorder (%p38_p11), %s122_s5, %s122_s5  ;;  %p196_p0 = scmp.lt.s32.totalorder (%p38_p11), %s194_s7, %s190_s6 }
  0x28   : > { %vm45_vm2 = vcmp.eq.s32.totalorder %v35_v2, %v44_v4 }
  0x29   : > { %v135_v6 = vsel %vm45_vm2, 1.0, %v229_v5  ;;  %p197_p1 = por (%p38_p11), %p196_p0, %p195_p13 }
  0x2a   : > { %v48_v7 = vadd.f32 %v135_v6, %v42_v3 }
  0x2b   :  { %p198_p2 = pnand (%p38_p11), %p197_p1, %p191_p12 }
  0x2c   : > { %49 = vst.msk [vmem:[#allocation3] sm:$0x1] %vm32_vm1, %v48_v7 }
  0x33   :  { %v69_v21 = vld [vmem:[#allocation3] sm:$0x1] }
  0x34   :  { %vm76_vm4 = vcmp.gt.f32.partialorder %v69_v21, 0.0  ;;  %v90_v27 = vrot.slane %v69_v21, %v82_v23 }
  0x35   :  { %v79_v25 = vsel %vm76_vm4, 1, %v230_v24 }
  0x36   :  { %v83_v26 = vrot.slane %v79_v25, %v82_v23 }
  0x38   :  { %vm84_vm5 = vcmp.eq.s32.totalorder %v83_v26, 1 }
  0xb2   :  { %v54_v10 = vpop.xlane.xlu0 %53 }
  0xb3   :  { %v55_v11 = vsub.f32 %v50_v8, %v54_v10 }
  0xb5   :  { %v56_v12 = vmul.f32 1.442695, %v55_v11 }
  0xb7   :  { %152 = vpow2.f32 %v56_v12 }
  0xc1   :  { %v153_v13 = vpop.eup %152 }
  0xc2   :  { %v58_v14 = vsel %vm51_vm3, %v153_v13, 0.0 }
  0xc3   :  { %59 = vadd.xlane.f32.xlu0 %v58_v14 }
 0x150   :  { %v60_v15 = vpop.xlane.xlu0 %59 }
 0x151   :  { %154 = vrcp.f32 %v60_v15  ;;  %v63_v16 = vsub.f32 %v60_v15, %v153_v13 }
 0x15b   :  { %v155_v17 = vpop.eup %154 }
 0x15c   :  { %v64_v18 = vmul.f32 %v155_v17, %v63_v16 }
 0x15e   :  { %v65_v19 = vmul.f32 0.9, %v64_v18 }
 0x160   :  { %v66_v20 = vadd.f32 0.096875, %v65_v19 }
 0x162   :  { %156 = vlog2.f32 %v66_v20 }
 0x16c   :  { %v157_v28 = vpop.eup %156 }
 0x16d   :  { %v68_v29 = vmul.f32 0.6931472, %v157_v28 }
 0x16f   :  { %v92_v30 = vmul.f32 %v90_v27, %v68_v29 }
 0x171   :  { %v93_v31 = vsel %vm84_vm5, %v92_v30, 0.0 }
 0x172   :  { %v95_v32 = vsel %vm51_vm3, %v93_v31, 0.0 }
 0x173   :  { %96 = vadd.xlane.f32.xlu1 %v95_v32 }
 0x200   :  { %v97_v33 = vpop.xlane.xlu1 %96 }
 0x201   :  { %v98_v34 = vrot.slane %v97_v33, 4 }
 0x203   :  { %v99_v35 = vadd.f32 %v98_v34, %v97_v33 }
 0x205   :  { %v100_v36 = vrot.slane %v99_v35, 2 }
 0x207   :  { %v101_v37 = vadd.f32 %v100_v36, %v99_v35 }
 0x209   :  { %v102_v38 = vrot.slane %v101_v37, 1 }
 0x20b   :  { %v103_v39 = vadd.f32 %v102_v38, %v101_v37 }
 0x20d   :  { %136 = vpush %v103_v39 }
 0x23e   :  { %s137_s1 = spop %136 }
 0x23f   :  { %v105_v41 = vstv %s137_s1 }
 0x240   :  { %v106_v42 = vadd.f32 %v105_v41, %v94_v40 }
 0x242   :  { %108 = vst.msk [vmem:[#allocation2] sm:$0x1] %vm30_vm0, %v106_v42 }
 0x249   :  { %v112_v43 = vld [vmem:[#allocation2] sm:$0x1] }
 0x24a   :  { %v113_v44 = vmul.f32 0.015625, %v112_v43 }
 0x24c   :  { %114 = vst.msk [vmem:[#allocation9] sm:$0x1] %vm30_vm0, %v113_v44 }
 0x24d   :  { %201 = shalt.err (!%p198_p2)
}
 0x24e   :  { %s202_s10 = scalar_lea.hbm %s293_s2, 16 }
 0x24f   :  { %p203_p3 = scmp.ne.s32.totalorder %s293_s2, %s202_s10  ;;  %p206_p4 = scmp.lt.u32.totalorder %s202_s10, %s293_s2 }
 0x251   :  { %p208_p5 = pnand %p206_p4, %p203_p3 }
 0x253   :  { %211 = shalt.err (!%p208_p5)
}
 0x254   :  { %124 = dma.vmem_to_hbm [thread:$0]  %s122_s5, 16, %s293_s2, [#allocation8]  }
 0x255   :  { %220 = dma.done.wait [#allocation8], 16  }
 0x256   :  { %221 = vsyncadd [#allocation8], 4294967280 }
 0x257   :  { %128 = vsyncpa [#allocation7], 1 }
 0x258   :  { %129 = vsyncpa [#allocation8], 1 }

</bundles_post_ra>
